<compile_context>
chip_gen: v7x
topology: tpu7x:2x2x1
jax: 0.10.0
libtpu: 0.0.40
codegen_flags: <defaults>
</compile_context>

<pallas_src>
import jax
import jax.numpy as jnp
from jax import lax
from jax.experimental import pallas as pl
from jax.experimental.pallas import tpu as pltpu


def _crf_forward_kernel(em_ref, len_ref, etrT_ref, start_ref, end_ref, out_ref):
    # em_ref:    (S, T, TB) f32  emissions (cmax pre-folded), batch on lanes
    # len_ref:   (1, TB)    i32  per-sample sequence lengths
    # etrT_ref:  (T, T)     f32  etrT[k, j] = exp(trans[j, k] - cmax[k])
    # start_ref: (T, 1)     f32  start_trans - cmax
    # end_ref:   (T, 1)     f32  end_trans
    # out_ref:   (1, TB)    f32  per-sample all-path score (log Z), lane-dense
    S, T, TB = em_ref.shape
    len_row = len_ref[...]                                     # (1, TB)
    etrT = etrT_ref[...]                                       # (T, T)

    small_T = T <= 16
    if small_T:
        # Hoist the lane-broadcast of each transition column out of the serial
        # S loop (JAX does not CSE broadcast_in_dim; per-step broadcasts would
        # sit on the critical path).
        etr_cols = [jnp.broadcast_to(etrT[:, j:j + 1], (T, TB))
                    for j in range(T)]

    alpha0 = start_ref[...] + em_ref[0]                        # (T, TB)

    def step(i, alpha):
        am = jnp.max(alpha, axis=0, keepdims=True)             # (1, TB)
        p = jnp.exp(alpha - am)                                # (T, TB)
        if small_T:
            # (T,T) x (T,TB) contraction as T f32 broadcast-FMAs on the VPU;
            # a K=N=T<=16 matmul would waste the MXU and put its drain latency
            # on the serial dependence chain every step.
            s = etr_cols[0] * p[0:1, :]
            for j in range(1, T):
                s = s + etr_cols[j] * p[j:j + 1, :]
        else:
            prec = lax.Precision.HIGH if T >= 128 else lax.Precision.HIGHEST
            s = jnp.dot(etrT, p, preferred_element_type=jnp.float32,
                        precision=prec)
        nxt = am + jnp.log(s) + em_ref[i]                      # cmax already in em
        return jnp.where(i < len_row, nxt, alpha)              # mask: i < length

    unroll = True if S <= 16 else 8
    alpha = lax.fori_loop(1, S, step, alpha0, unroll=unroll)

    alpha = alpha + end_ref[...]                               # (T, TB) + (T, 1)
    am = jnp.max(alpha, axis=0, keepdims=True)
    out_ref[...] = am + jnp.log(
        jnp.sum(jnp.exp(alpha - am), axis=0, keepdims=True))   # (1, TB)


def _pick_batch_tile(S, B_pad, T, vmem_budget_bytes=16 * 1024 * 1024):
    """Largest lane tile (multiple of 128, dividing B_pad) whose double-buffered
    emission slab fits a conservative budget that is safe on v5e/v6e/v7x; forces
    >= 2 grid steps when the padded batch allows it (v7x: shards across both
    TensorCores via dimension_semantics=('parallel',))."""
    per_lane = 2 * S * max(T, 8) * 4                 # 2x = double buffering, f32
    cap = max(128, (vmem_budget_bytes // per_lane) // 128 * 128)
    tb = min(B_pad, cap)
    if B_pad >= 256 and tb > B_pad // 2:
        tb = B_pad // 2                              # >= 2 grid steps
    tb = max(128, (tb // 128) * 128)
    while B_pad % tb:
        tb -= 128
    return tb
    # TODO(synk): for very large S*T (slab > budget even at tb=128) the sequence
    # axis itself would need tiling (alpha carried in VMEM scratch across an
    # 'arbitrary' S grid axis); not needed for typical NER shapes.


def batch_crf_nll(emissions, tags, mask, transitions, start_trans, end_trans,
                  *, batch_tile=None):
    """Equivalent of BatchCRF.forward / neg_likelihood (batch_first=False)."""
    S, B, T = emissions.shape
    em = emissions.astype(jnp.float32)
    trans = transitions.astype(jnp.float32)
    start = start_trans.astype(jnp.float32)
    end = end_trans.astype(jnp.float32)
    maskf = mask.astype(jnp.float32)
    tags = tags.astype(jnp.int32)

    # ---------------- gold path score: plain XLA gathers ----------------
    b_idx = jnp.arange(B)
    em_tag = jnp.take_along_axis(em, tags[:, :, None], axis=2)[:, :, 0]  # (S, B)
    step_sc = trans[tags[:-1], tags[1:]] + em_tag[1:]                    # (S-1, B)
    gold = start[tags[0]] + em_tag[0] + jnp.sum(step_sc * maskf[1:], axis=0)
    lengths = maskf.sum(axis=0).astype(jnp.int32)                        # (B,)
    last_tags = tags[lengths - 1, b_idx]                                 # (B,)
    gold = gold + end[last_tags]                                         # (B,)

    # -------- all-path score: Pallas serial forward recursion --------
    cmax = jnp.max(trans, axis=0)                                        # (T,)
    etrT = jnp.exp(trans - cmax[None, :]).T                              # (T_k, T_j)
    start_shift = (start - cmax).reshape(T, 1)
    end_col = end.reshape(T, 1)

    # Lane-dense layout: batch on lanes (padded to a multiple of 128),
    # tags on sublanes; cmax folded into emissions once here.
    em_t = jnp.transpose(em + cmax[None, None, :], (0, 2, 1))            # (S, T, B)
    B_pad = max(128, -(-B // 128) * 128)
    if B_pad != B:
        em_t = jnp.pad(em_t, ((0, 0), (0, 0), (0, B_pad - B)))
        len_pad = jnp.pad(lengths, (0, B_pad - B))                       # len=0 pads
    else:
        len_pad = lengths
    len_row = len_pad.reshape(1, B_pad).astype(jnp.int32)

    tb = batch_tile if batch_tile is not None else _pick_batch_tile(S, B_pad, T)
    assert B_pad % tb == 0 and tb % 128 == 0
    grid = (B_pad // tb,)

    all_score = pl.pallas_call(
        _crf_forward_kernel,
        out_shape=jax.ShapeDtypeStruct((1, B_pad), jnp.float32),
        grid=grid,
        in_specs=[
            pl.BlockSpec((S, T, tb), lambda b: (0, 0, b)),   # emissions tile
            pl.BlockSpec((1, tb), lambda b: (0, b)),         # lengths row
            pl.BlockSpec((T, T), lambda b: (0, 0)),          # exp(trans - cmax).T
            pl.BlockSpec((T, 1), lambda b: (0, 0)),          # start - cmax
            pl.BlockSpec((T, 1), lambda b: (0, 0)),          # end
        ],
        out_specs=pl.BlockSpec((1, tb), lambda b: (0, b)),   # lane-dense store
        compiler_params=pltpu.CompilerParams(
            dimension_semantics=("parallel",),
            vmem_limit_bytes=32 * 1024 * 1024),
    )(em_t, len_row, etrT, start_shift, end_col)

    return jnp.mean(all_score[0, :B] - gold)


def _reference_nll(em, tags, mask, trans, start, end):
    """Pure-JAX transcription of the torch module, for verification."""
    S, B, T = em.shape
    mf = mask.astype(jnp.float32)
    score = start[tags[0]] + em[0, jnp.arange(B), tags[0]]
    for i in range(1, S):
        score = score + (trans[tags[i - 1], tags[i]]
                         + em[i, jnp.arange(B), tags[i]]) * mf[i]
    lengths = mf.sum(0).astype(jnp.int32) - 1
    last_tags = tags[lengths, jnp.arange(B)]
    gold = score + end[last_tags]

    def lse(x, axis):
        m = jnp.max(x, axis=axis, keepdims=True)
        return jnp.squeeze(m, axis) + jnp.log(jnp.sum(jnp.exp(x - m), axis=axis))

    alpha = start + em[0]
    for i in range(1, S):
        ns = alpha[:, :, None] + trans[None, :, :] + em[i][:, None, :]
        ns = lse(ns, 1)
        alpha = jnp.where(mask[i][:, None] > 0, ns, alpha)
    allsc = lse(alpha + end, 1)
    return jnp.mean(allsc - gold)


if __name__ == "__main__":
    S, B, T = 8, 16, 8   # seq_len, batch, nb_tags

    key = jax.random.PRNGKey(0)
    k_em, k_tag, k_len, k_tr, k_st, k_en = jax.random.split(key, 6)

    # "parameters" (matching nn.init.uniform_(-0.1, 0.1))
    transitions = jax.random.uniform(k_tr, (T, T), jnp.float32, -0.1, 0.1)
    start_trans = jax.random.uniform(k_st, (T,), jnp.float32, -0.1, 0.1)
    end_trans = jax.random.uniform(k_en, (T,), jnp.float32, -0.1, 0.1)

    # deterministic inputs
    emissions = jax.random.normal(k_em, (S, B, T), jnp.float32)
    tags = jax.random.randint(k_tag, (S, B), 0, T, jnp.int32)
    lengths = jax.random.randint(k_len, (B,), 1, S + 1)               # >= 1
    mask = (jnp.arange(S)[:, None] < lengths[None, :]).astype(jnp.int32)

    crf = jax.jit(batch_crf_nll)
    loss = crf(emissions, tags, mask, transitions, start_trans, end_trans)
    loss = jax.block_until_ready(loss)

    ref = _reference_nll(emissions, tags, mask, transitions, start_trans,
                         end_trans)
    if not jnp.allclose(loss, ref, atol=1e-3, rtol=1e-3):
        raise AssertionError(f"mismatch: kernel={loss} ref={ref}")

    print("KERNEL_OK")
</pallas_src>

<mosaic_0001>
module attributes {stable_mosaic.version = 11 : i64} {
  func.func @_crf_forward_kernel(%arg0: i32, %arg1: memref<8x8x128xf32, #tpu.memory_space<vmem>>, %arg2: memref<1x128xi32, #tpu.memory_space<vmem>>, %arg3: memref<8x8xf32, #tpu.memory_space<vmem>>, %arg4: memref<8x1xf32, #tpu.memory_space<vmem>>, %arg5: memref<8x1xf32, #tpu.memory_space<vmem>>, %arg6: memref<1x128xf32, #tpu.memory_space<vmem>>) attributes {dimension_semantics = [#tpu.dimension_semantics<parallel>], iteration_bounds = array<i64: 1>, scalar_prefetch = 0 : i64, scratch_operands = 0 : i64, tpu.core_type = #tpu.core_type<tc>, window_params = [{transform_indices = @transform_0, window_bounds = array<i64: 8, 8, 128>}, {transform_indices = @transform_1, window_bounds = array<i64: 1, 128>}, {pipeline_mode = #tpu.pipeline_mode<synchronous>, transform_indices = @transform_2, window_bounds = array<i64: 8, 8>}, {pipeline_mode = #tpu.pipeline_mode<synchronous>, transform_indices = @transform_3, window_bounds = array<i64: 8, 1>}, {pipeline_mode = #tpu.pipeline_mode<synchronous>, transform_indices = @transform_4, window_bounds = array<i64: 8, 1>}, {transform_indices = @transform_5, window_bounds = array<i64: 1, 128>}]} {
    %c0 = arith.constant 0 : index
    %c0_0 = arith.constant 0 : index
    %0 = vector.load %arg2[%c0, %c0_0] : memref<1x128xi32, #tpu.memory_space<vmem>>, vector<1x128xi32>
    %c0_1 = arith.constant 0 : index
    %c0_2 = arith.constant 0 : index
    %1 = vector.load %arg3[%c0_1, %c0_2] : memref<8x8xf32, #tpu.memory_space<vmem>>, vector<8x8xf32>
    %2 = vector.extract_strided_slice %1 {offsets = [0, 0], sizes = [8, 1], strides = [1, 1]} : vector<8x8xf32> to vector<8x1xf32>
    %3 = vector.shape_cast %2 : vector<8x1xf32> to vector<8x1xf32>
    %4 = vector.broadcast %3 : vector<8x1xf32> to vector<8x128xf32>
    %5 = vector.extract_strided_slice %1 {offsets = [0, 1], sizes = [8, 1], strides = [1, 1]} : vector<8x8xf32> to vector<8x1xf32>
    %6 = vector.shape_cast %5 : vector<8x1xf32> to vector<8x1xf32>
    %7 = vector.broadcast %6 : vector<8x1xf32> to vector<8x128xf32>
    %8 = vector.extract_strided_slice %1 {offsets = [0, 2], sizes = [8, 1], strides = [1, 1]} : vector<8x8xf32> to vector<8x1xf32>
    %9 = vector.shape_cast %8 : vector<8x1xf32> to vector<8x1xf32>
    %10 = vector.broadcast %9 : vector<8x1xf32> to vector<8x128xf32>
    %11 = vector.extract_strided_slice %1 {offsets = [0, 3], sizes = [8, 1], strides = [1, 1]} : vector<8x8xf32> to vector<8x1xf32>
    %12 = vector.shape_cast %11 : vector<8x1xf32> to vector<8x1xf32>
    %13 = vector.broadcast %12 : vector<8x1xf32> to vector<8x128xf32>
    %14 = vector.extract_strided_slice %1 {offsets = [0, 4], sizes = [8, 1], strides = [1, 1]} : vector<8x8xf32> to vector<8x1xf32>
    %15 = vector.shape_cast %14 : vector<8x1xf32> to vector<8x1xf32>
    %16 = vector.broadcast %15 : vector<8x1xf32> to vector<8x128xf32>
    %17 = vector.extract_strided_slice %1 {offsets = [0, 5], sizes = [8, 1], strides = [1, 1]} : vector<8x8xf32> to vector<8x1xf32>
    %18 = vector.shape_cast %17 : vector<8x1xf32> to vector<8x1xf32>
    %19 = vector.broadcast %18 : vector<8x1xf32> to vector<8x128xf32>
    %20 = vector.extract_strided_slice %1 {offsets = [0, 6], sizes = [8, 1], strides = [1, 1]} : vector<8x8xf32> to vector<8x1xf32>
    %21 = vector.shape_cast %20 : vector<8x1xf32> to vector<8x1xf32>
    %22 = vector.broadcast %21 : vector<8x1xf32> to vector<8x128xf32>
    %23 = vector.extract_strided_slice %1 {offsets = [0, 7], sizes = [8, 1], strides = [1, 1]} : vector<8x8xf32> to vector<8x1xf32>
    %24 = vector.shape_cast %23 : vector<8x1xf32> to vector<8x1xf32>
    %25 = vector.broadcast %24 : vector<8x1xf32> to vector<8x128xf32>
    %c0_3 = arith.constant 0 : index
    %c0_4 = arith.constant 0 : index
    %26 = vector.load %arg4[%c0_3, %c0_4] : memref<8x1xf32, #tpu.memory_space<vmem>>, vector<8x1xf32>
    %c0_5 = arith.constant 0 : index
    %c0_6 = arith.constant 0 : index
    %c0_7 = arith.constant 0 : index
    %27 = vector.load %arg1[%c0_5, %c0_6, %c0_7] : memref<8x8x128xf32, #tpu.memory_space<vmem>>, vector<1x8x128xf32>
    %28 = vector.shape_cast %27 : vector<1x8x128xf32> to vector<8x128xf32>
    %29 = vector.broadcast %26 : vector<8x1xf32> to vector<8x128xf32>
    %30 = arith.addf %29, %28 : vector<8x128xf32>
    %c1_i32 = arith.constant 1 : i32
    %cst = arith.constant dense<0xFF800000> : vector<128xf32>
    %31 = vector.multi_reduction <maximumf>, %30, %cst [0] : vector<8x128xf32> to vector<128xf32>
    %32 = vector.shape_cast %31 : vector<128xf32> to vector<1x128xf32>
    %33 = vector.broadcast %32 : vector<1x128xf32> to vector<8x128xf32>
    %34 = arith.subf %30, %33 : vector<8x128xf32>
    %35 = math.exp %34 : vector<8x128xf32>
    %36 = vector.extract_strided_slice %35 {offsets = [0, 0], sizes = [1, 128], strides = [1, 1]} : vector<8x128xf32> to vector<1x128xf32>
    %37 = vector.broadcast %36 : vector<1x128xf32> to vector<8x128xf32>
    %38 = arith.mulf %4, %37 : vector<8x128xf32>
    %39 = vector.extract_strided_slice %35 {offsets = [1, 0], sizes = [1, 128], strides = [1, 1]} : vector<8x128xf32> to vector<1x128xf32>
    %40 = vector.broadcast %39 : vector<1x128xf32> to vector<8x128xf32>
    %41 = arith.mulf %7, %40 : vector<8x128xf32>
    %42 = arith.addf %38, %41 : vector<8x128xf32>
    %43 = vector.extract_strided_slice %35 {offsets = [2, 0], sizes = [1, 128], strides = [1, 1]} : vector<8x128xf32> to vector<1x128xf32>
    %44 = vector.broadcast %43 : vector<1x128xf32> to vector<8x128xf32>
    %45 = arith.mulf %10, %44 : vector<8x128xf32>
    %46 = arith.addf %42, %45 : vector<8x128xf32>
    %47 = vector.extract_strided_slice %35 {offsets = [3, 0], sizes = [1, 128], strides = [1, 1]} : vector<8x128xf32> to vector<1x128xf32>
    %48 = vector.broadcast %47 : vector<1x128xf32> to vector<8x128xf32>
    %49 = arith.mulf %13, %48 : vector<8x128xf32>
    %50 = arith.addf %46, %49 : vector<8x128xf32>
    %51 = vector.extract_strided_slice %35 {offsets = [4, 0], sizes = [1, 128], strides = [1, 1]} : vector<8x128xf32> to vector<1x128xf32>
    %52 = vector.broadcast %51 : vector<1x128xf32> to vector<8x128xf32>
    %53 = arith.mulf %16, %52 : vector<8x128xf32>
    %54 = arith.addf %50, %53 : vector<8x128xf32>
    %55 = vector.extract_strided_slice %35 {offsets = [5, 0], sizes = [1, 128], strides = [1, 1]} : vector<8x128xf32> to vector<1x128xf32>
    %56 = vector.broadcast %55 : vector<1x128xf32> to vector<8x128xf32>
    %57 = arith.mulf %19, %56 : vector<8x128xf32>
    %58 = arith.addf %54, %57 : vector<8x128xf32>
    %59 = vector.extract_strided_slice %35 {offsets = [6, 0], sizes = [1, 128], strides = [1, 1]} : vector<8x128xf32> to vector<1x128xf32>
    %60 = vector.broadcast %59 : vector<1x128xf32> to vector<8x128xf32>
    %61 = arith.mulf %22, %60 : vector<8x128xf32>
    %62 = arith.addf %58, %61 : vector<8x128xf32>
    %63 = vector.extract_strided_slice %35 {offsets = [7, 0], sizes = [1, 128], strides = [1, 1]} : vector<8x128xf32> to vector<1x128xf32>
    %64 = vector.broadcast %63 : vector<1x128xf32> to vector<8x128xf32>
    %65 = arith.mulf %25, %64 : vector<8x128xf32>
    %66 = arith.addf %62, %65 : vector<8x128xf32>
    %67 = math.log %66 : vector<8x128xf32>
    %68 = vector.broadcast %32 : vector<1x128xf32> to vector<8x128xf32>
    %69 = arith.addf %68, %67 : vector<8x128xf32>
    %70 = arith.index_cast %c1_i32 : i32 to index
    %c0_8 = arith.constant 0 : index
    %c0_9 = arith.constant 0 : index
    %71 = vector.load %arg1[%70, %c0_8, %c0_9] : memref<8x8x128xf32, #tpu.memory_space<vmem>>, vector<1x8x128xf32>
    %72 = vector.shape_cast %71 : vector<1x8x128xf32> to vector<8x128xf32>
    %73 = arith.addf %69, %72 : vector<8x128xf32>
    %74 = vector.broadcast %c1_i32 : i32 to vector<1x128xi32>
    %75 = arith.cmpi slt, %74, %0 : vector<1x128xi32>
    %76 = vector.shape_cast %75 : vector<1x128xi1> to vector<1x128xi1>
    %77 = vector.broadcast %76 : vector<1x128xi1> to vector<8x128xi1>
    %78 = arith.select %77, %73, %30 : vector<8x128xi1>, vector<8x128xf32>
    %c2_i32 = arith.constant 2 : i32
    %cst_10 = arith.constant dense<0xFF800000> : vector<128xf32>
    %79 = vector.multi_reduction <maximumf>, %78, %cst_10 [0] : vector<8x128xf32> to vector<128xf32>
    %80 = vector.shape_cast %79 : vector<128xf32> to vector<1x128xf32>
    %81 = vector.broadcast %80 : vector<1x128xf32> to vector<8x128xf32>
    %82 = arith.subf %78, %81 : vector<8x128xf32>
    %83 = math.exp %82 : vector<8x128xf32>
    %84 = vector.extract_strided_slice %83 {offsets = [0, 0], sizes = [1, 128], strides = [1, 1]} : vector<8x128xf32> to vector<1x128xf32>
    %85 = vector.broadcast %84 : vector<1x128xf32> to vector<8x128xf32>
    %86 = arith.mulf %4, %85 : vector<8x128xf32>
    %87 = vector.extract_strided_slice %83 {offsets = [1, 0], sizes = [1, 128], strides = [1, 1]} : vector<8x128xf32> to vector<1x128xf32>
    %88 = vector.broadcast %87 : vector<1x128xf32> to vector<8x128xf32>
    %89 = arith.mulf %7, %88 : vector<8x128xf32>
    %90 = arith.addf %86, %89 : vector<8x128xf32>
    %91 = vector.extract_strided_slice %83 {offsets = [2, 0], sizes = [1, 128], strides = [1, 1]} : vector<8x128xf32> to vector<1x128xf32>
    %92 = vector.broadcast %91 : vector<1x128xf32> to vector<8x128xf32>
    %93 = arith.mulf %10, %92 : vector<8x128xf32>
    %94 = arith.addf %90, %93 : vector<8x128xf32>
    %95 = vector.extract_strided_slice %83 {offsets = [3, 0], sizes = [1, 128], strides = [1, 1]} : vector<8x128xf32> to vector<1x128xf32>
    %96 = vector.broadcast %95 : vector<1x128xf32> to vector<8x128xf32>
    %97 = arith.mulf %13, %96 : vector<8x128xf32>
    %98 = arith.addf %94, %97 : vector<8x128xf32>
    %99 = vector.extract_strided_slice %83 {offsets = [4, 0], sizes = [1, 128], strides = [1, 1]} : vector<8x128xf32> to vector<1x128xf32>
    %100 = vector.broadcast %99 : vector<1x128xf32> to vector<8x128xf32>
    %101 = arith.mulf %16, %100 : vector<8x128xf32>
    %102 = arith.addf %98, %101 : vector<8x128xf32>
    %103 = vector.extract_strided_slice %83 {offsets = [5, 0], sizes = [1, 128], strides = [1, 1]} : vector<8x128xf32> to vector<1x128xf32>
    %104 = vector.broadcast %103 : vector<1x128xf32> to vector<8x128xf32>
    %105 = arith.mulf %19, %104 : vector<8x128xf32>
    %106 = arith.addf %102, %105 : vector<8x128xf32>
    %107 = vector.extract_strided_slice %83 {offsets = [6, 0], sizes = [1, 128], strides = [1, 1]} : vector<8x128xf32> to vector<1x128xf32>
    %108 = vector.broadcast %107 : vector<1x128xf32> to vector<8x128xf32>
    %109 = arith.mulf %22, %108 : vector<8x128xf32>
    %110 = arith.addf %106, %109 : vector<8x128xf32>
    %111 = vector.extract_strided_slice %83 {offsets = [7, 0], sizes = [1, 128], strides = [1, 1]} : vector<8x128xf32> to vector<1x128xf32>
    %112 = vector.broadcast %111 : vector<1x128xf32> to vector<8x128xf32>
    %113 = arith.mulf %25, %112 : vector<8x128xf32>
    %114 = arith.addf %110, %113 : vector<8x128xf32>
    %115 = math.log %114 : vector<8x128xf32>
    %116 = vector.broadcast %80 : vector<1x128xf32> to vector<8x128xf32>
    %117 = arith.addf %116, %115 : vector<8x128xf32>
    %118 = arith.index_cast %c2_i32 : i32 to index
    %c0_11 = arith.constant 0 : index
    %c0_12 = arith.constant 0 : index
    %119 = vector.load %arg1[%118, %c0_11, %c0_12] : memref<8x8x128xf32, #tpu.memory_space<vmem>>, vector<1x8x128xf32>
    %120 = vector.shape_cast %119 : vector<1x8x128xf32> to vector<8x128xf32>
    %121 = arith.addf %117, %120 : vector<8x128xf32>
    %122 = vector.broadcast %c2_i32 : i32 to vector<1x128xi32>
    %123 = arith.cmpi slt, %122, %0 : vector<1x128xi32>
    %124 = vector.shape_cast %123 : vector<1x128xi1> to vector<1x128xi1>
    %125 = vector.broadcast %124 : vector<1x128xi1> to vector<8x128xi1>
    %126 = arith.select %125, %121, %78 : vector<8x128xi1>, vector<8x128xf32>
    %c3_i32 = arith.constant 3 : i32
    %cst_13 = arith.constant dense<0xFF800000> : vector<128xf32>
    %127 = vector.multi_reduction <maximumf>, %126, %cst_13 [0] : vector<8x128xf32> to vector<128xf32>
    %128 = vector.shape_cast %127 : vector<128xf32> to vector<1x128xf32>
    %129 = vector.broadcast %128 : vector<1x128xf32> to vector<8x128xf32>
    %130 = arith.subf %126, %129 : vector<8x128xf32>
    %131 = math.exp %130 : vector<8x128xf32>
    %132 = vector.extract_strided_slice %131 {offsets = [0, 0], sizes = [1, 128], strides = [1, 1]} : vector<8x128xf32> to vector<1x128xf32>
    %133 = vector.broadcast %132 : vector<1x128xf32> to vector<8x128xf32>
    %134 = arith.mulf %4, %133 : vector<8x128xf32>
    %135 = vector.extract_strided_slice %131 {offsets = [1, 0], sizes = [1, 128], strides = [1, 1]} : vector<8x128xf32> to vector<1x128xf32>
    %136 = vector.broadcast %135 : vector<1x128xf32> to vector<8x128xf32>
    %137 = arith.mulf %7, %136 : vector<8x128xf32>
    %138 = arith.addf %134, %137 : vector<8x128xf32>
    %139 = vector.extract_strided_slice %131 {offsets = [2, 0], sizes = [1, 128], strides = [1, 1]} : vector<8x128xf32> to vector<1x128xf32>
    %140 = vector.broadcast %139 : vector<1x128xf32> to vector<8x128xf32>
    %141 = arith.mulf %10, %140 : vector<8x128xf32>
    %142 = arith.addf %138, %141 : vector<8x128xf32>
    %143 = vector.extract_strided_slice %131 {offsets = [3, 0], sizes = [1, 128], strides = [1, 1]} : vector<8x128xf32> to vector<1x128xf32>
    %144 = vector.broadcast %143 : vector<1x128xf32> to vector<8x128xf32>
    %145 = arith.mulf %13, %144 : vector<8x128xf32>
    %146 = arith.addf %142, %145 : vector<8x128xf32>
    %147 = vector.extract_strided_slice %131 {offsets = [4, 0], sizes = [1, 128], strides = [1, 1]} : vector<8x128xf32> to vector<1x128xf32>
    %148 = vector.broadcast %147 : vector<1x128xf32> to vector<8x128xf32>
    %149 = arith.mulf %16, %148 : vector<8x128xf32>
    %150 = arith.addf %146, %149 : vector<8x128xf32>
    %151 = vector.extract_strided_slice %131 {offsets = [5, 0], sizes = [1, 128], strides = [1, 1]} : vector<8x128xf32> to vector<1x128xf32>
    %152 = vector.broadcast %151 : vector<1x128xf32> to vector<8x128xf32>
    %153 = arith.mulf %19, %152 : vector<8x128xf32>
    %154 = arith.addf %150, %153 : vector<8x128xf32>
    %155 = vector.extract_strided_slice %131 {offsets = [6, 0], sizes = [1, 128], strides = [1, 1]} : vector<8x128xf32> to vector<1x128xf32>
    %156 = vector.broadcast %155 : vector<1x128xf32> to vector<8x128xf32>
    %157 = arith.mulf %22, %156 : vector<8x128xf32>
    %158 = arith.addf %154, %157 : vector<8x128xf32>
    %159 = vector.extract_strided_slice %131 {offsets = [7, 0], sizes = [1, 128], strides = [1, 1]} : vector<8x128xf32> to vector<1x128xf32>
    %160 = vector.broadcast %159 : vector<1x128xf32> to vector<8x128xf32>
    %161 = arith.mulf %25, %160 : vector<8x128xf32>
    %162 = arith.addf %158, %161 : vector<8x128xf32>
    %163 = math.log %162 : vector<8x128xf32>
    %164 = vector.broadcast %128 : vector<1x128xf32> to vector<8x128xf32>
    %165 = arith.addf %164, %163 : vector<8x128xf32>
    %166 = arith.index_cast %c3_i32 : i32 to index
    %c0_14 = arith.constant 0 : index
    %c0_15 = arith.constant 0 : index
    %167 = vector.load %arg1[%166, %c0_14, %c0_15] : memref<8x8x128xf32, #tpu.memory_space<vmem>>, vector<1x8x128xf32>
    %168 = vector.shape_cast %167 : vector<1x8x128xf32> to vector<8x128xf32>
    %169 = arith.addf %165, %168 : vector<8x128xf32>
    %170 = vector.broadcast %c3_i32 : i32 to vector<1x128xi32>
    %171 = arith.cmpi slt, %170, %0 : vector<1x128xi32>
    %172 = vector.shape_cast %171 : vector<1x128xi1> to vector<1x128xi1>
    %173 = vector.broadcast %172 : vector<1x128xi1> to vector<8x128xi1>
    %174 = arith.select %173, %169, %126 : vector<8x128xi1>, vector<8x128xf32>
    %c4_i32 = arith.constant 4 : i32
    %cst_16 = arith.constant dense<0xFF800000> : vector<128xf32>
    %175 = vector.multi_reduction <maximumf>, %174, %cst_16 [0] : vector<8x128xf32> to vector<128xf32>
    %176 = vector.shape_cast %175 : vector<128xf32> to vector<1x128xf32>
    %177 = vector.broadcast %176 : vector<1x128xf32> to vector<8x128xf32>
    %178 = arith.subf %174, %177 : vector<8x128xf32>
    %179 = math.exp %178 : vector<8x128xf32>
    %180 = vector.extract_strided_slice %179 {offsets = [0, 0], sizes = [1, 128], strides = [1, 1]} : vector<8x128xf32> to vector<1x128xf32>
    %181 = vector.broadcast %180 : vector<1x128xf32> to vector<8x128xf32>
    %182 = arith.mulf %4, %181 : vector<8x128xf32>
    %183 = vector.extract_strided_slice %179 {offsets = [1, 0], sizes = [1, 128], strides = [1, 1]} : vector<8x128xf32> to vector<1x128xf32>
    %184 = vector.broadcast %183 : vector<1x128xf32> to vector<8x128xf32>
    %185 = arith.mulf %7, %184 : vector<8x128xf32>
    %186 = arith.addf %182, %185 : vector<8x128xf32>
    %187 = vector.extract_strided_slice %179 {offsets = [2, 0], sizes = [1, 128], strides = [1, 1]} : vector<8x128xf32> to vector<1x128xf32>
    %188 = vector.broadcast %187 : vector<1x128xf32> to vector<8x128xf32>
    %189 = arith.mulf %10, %188 : vector<8x128xf32>
    %190 = arith.addf %186, %189 : vector<8x128xf32>
    %191 = vector.extract_strided_slice %179 {offsets = [3, 0], sizes = [1, 128], strides = [1, 1]} : vector<8x128xf32> to vector<1x128xf32>
    %192 = vector.broadcast %191 : vector<1x128xf32> to vector<8x128xf32>
    %193 = arith.mulf %13, %192 : vector<8x128xf32>
    %194 = arith.addf %190, %193 : vector<8x128xf32>
    %195 = vector.extract_strided_slice %179 {offsets = [4, 0], sizes = [1, 128], strides = [1, 1]} : vector<8x128xf32> to vector<1x128xf32>
    %196 = vector.broadcast %195 : vector<1x128xf32> to vector<8x128xf32>
    %197 = arith.mulf %16, %196 : vector<8x128xf32>
    %198 = arith.addf %194, %197 : vector<8x128xf32>
    %199 = vector.extract_strided_slice %179 {offsets = [5, 0], sizes = [1, 128], strides = [1, 1]} : vector<8x128xf32> to vector<1x128xf32>
    %200 = vector.broadcast %199 : vector<1x128xf32> to vector<8x128xf32>
    %201 = arith.mulf %19, %200 : vector<8x128xf32>
    %202 = arith.addf %198, %201 : vector<8x128xf32>
    %203 = vector.extract_strided_slice %179 {offsets = [6, 0], sizes = [1, 128], strides = [1, 1]} : vector<8x128xf32> to vector<1x128xf32>
    %204 = vector.broadcast %203 : vector<1x128xf32> to vector<8x128xf32>
    %205 = arith.mulf %22, %204 : vector<8x128xf32>
    %206 = arith.addf %202, %205 : vector<8x128xf32>
    %207 = vector.extract_strided_slice %179 {offsets = [7, 0], sizes = [1, 128], strides = [1, 1]} : vector<8x128xf32> to vector<1x128xf32>
    %208 = vector.broadcast %207 : vector<1x128xf32> to vector<8x128xf32>
    %209 = arith.mulf %25, %208 : vector<8x128xf32>
    %210 = arith.addf %206, %209 : vector<8x128xf32>
    %211 = math.log %210 : vector<8x128xf32>
    %212 = vector.broadcast %176 : vector<1x128xf32> to vector<8x128xf32>
    %213 = arith.addf %212, %211 : vector<8x128xf32>
    %214 = arith.index_cast %c4_i32 : i32 to index
    %c0_17 = arith.constant 0 : index
    %c0_18 = arith.constant 0 : index
    %215 = vector.load %arg1[%214, %c0_17, %c0_18] : memref<8x8x128xf32, #tpu.memory_space<vmem>>, vector<1x8x128xf32>
    %216 = vector.shape_cast %215 : vector<1x8x128xf32> to vector<8x128xf32>
    %217 = arith.addf %213, %216 : vector<8x128xf32>
    %218 = vector.broadcast %c4_i32 : i32 to vector<1x128xi32>
    %219 = arith.cmpi slt, %218, %0 : vector<1x128xi32>
    %220 = vector.shape_cast %219 : vector<1x128xi1> to vector<1x128xi1>
    %221 = vector.broadcast %220 : vector<1x128xi1> to vector<8x128xi1>
    %222 = arith.select %221, %217, %174 : vector<8x128xi1>, vector<8x128xf32>
    %c5_i32 = arith.constant 5 : i32
    %cst_19 = arith.constant dense<0xFF800000> : vector<128xf32>
    %223 = vector.multi_reduction <maximumf>, %222, %cst_19 [0] : vector<8x128xf32> to vector<128xf32>
    %224 = vector.shape_cast %223 : vector<128xf32> to vector<1x128xf32>
    %225 = vector.broadcast %224 : vector<1x128xf32> to vector<8x128xf32>
    %226 = arith.subf %222, %225 : vector<8x128xf32>
    %227 = math.exp %226 : vector<8x128xf32>
    %228 = vector.extract_strided_slice %227 {offsets = [0, 0], sizes = [1, 128], strides = [1, 1]} : vector<8x128xf32> to vector<1x128xf32>
    %229 = vector.broadcast %228 : vector<1x128xf32> to vector<8x128xf32>
    %230 = arith.mulf %4, %229 : vector<8x128xf32>
    %231 = vector.extract_strided_slice %227 {offsets = [1, 0], sizes = [1, 128], strides = [1, 1]} : vector<8x128xf32> to vector<1x128xf32>
    %232 = vector.broadcast %231 : vector<1x128xf32> to vector<8x128xf32>
    %233 = arith.mulf %7, %232 : vector<8x128xf32>
    %234 = arith.addf %230, %233 : vector<8x128xf32>
    %235 = vector.extract_strided_slice %227 {offsets = [2, 0], sizes = [1, 128], strides = [1, 1]} : vector<8x128xf32> to vector<1x128xf32>
    %236 = vector.broadcast %235 : vector<1x128xf32> to vector<8x128xf32>
    %237 = arith.mulf %10, %236 : vector<8x128xf32>
    %238 = arith.addf %234, %237 : vector<8x128xf32>
    %239 = vector.extract_strided_slice %227 {offsets = [3, 0], sizes = [1, 128], strides = [1, 1]} : vector<8x128xf32> to vector<1x128xf32>
    %240 = vector.broadcast %239 : vector<1x128xf32> to vector<8x128xf32>
    %241 = arith.mulf %13, %240 : vector<8x128xf32>
    %242 = arith.addf %238, %241 : vector<8x128xf32>
    %243 = vector.extract_strided_slice %227 {offsets = [4, 0], sizes = [1, 128], strides = [1, 1]} : vector<8x128xf32> to vector<1x128xf32>
    %244 = vector.broadcast %243 : vector<1x128xf32> to vector<8x128xf32>
    %245 = arith.mulf %16, %244 : vector<8x128xf32>
    %246 = arith.addf %242, %245 : vector<8x128xf32>
    %247 = vector.extract_strided_slice %227 {offsets = [5, 0], sizes = [1, 128], strides = [1, 1]} : vector<8x128xf32> to vector<1x128xf32>
    %248 = vector.broadcast %247 : vector<1x128xf32> to vector<8x128xf32>
    %249 = arith.mulf %19, %248 : vector<8x128xf32>
    %250 = arith.addf %246, %249 : vector<8x128xf32>
    %251 = vector.extract_strided_slice %227 {offsets = [6, 0], sizes = [1, 128], strides = [1, 1]} : vector<8x128xf32> to vector<1x128xf32>
    %252 = vector.broadcast %251 : vector<1x128xf32> to vector<8x128xf32>
    %253 = arith.mulf %22, %252 : vector<8x128xf32>
    %254 = arith.addf %250, %253 : vector<8x128xf32>
    %255 = vector.extract_strided_slice %227 {offsets = [7, 0], sizes = [1, 128], strides = [1, 1]} : vector<8x128xf32> to vector<1x128xf32>
    %256 = vector.broadcast %255 : vector<1x128xf32> to vector<8x128xf32>
    %257 = arith.mulf %25, %256 : vector<8x128xf32>
    %258 = arith.addf %254, %257 : vector<8x128xf32>
    %259 = math.log %258 : vector<8x128xf32>
    %260 = vector.broadcast %224 : vector<1x128xf32> to vector<8x128xf32>
    %261 = arith.addf %260, %259 : vector<8x128xf32>
    %262 = arith.index_cast %c5_i32 : i32 to index
    %c0_20 = arith.constant 0 : index
    %c0_21 = arith.constant 0 : index
    %263 = vector.load %arg1[%262, %c0_20, %c0_21] : memref<8x8x128xf32, #tpu.memory_space<vmem>>, vector<1x8x128xf32>
    %264 = vector.shape_cast %263 : vector<1x8x128xf32> to vector<8x128xf32>
    %265 = arith.addf %261, %264 : vector<8x128xf32>
    %266 = vector.broadcast %c5_i32 : i32 to vector<1x128xi32>
    %267 = arith.cmpi slt, %266, %0 : vector<1x128xi32>
    %268 = vector.shape_cast %267 : vector<1x128xi1> to vector<1x128xi1>
    %269 = vector.broadcast %268 : vector<1x128xi1> to vector<8x128xi1>
    %270 = arith.select %269, %265, %222 : vector<8x128xi1>, vector<8x128xf32>
    %c6_i32 = arith.constant 6 : i32
    %cst_22 = arith.constant dense<0xFF800000> : vector<128xf32>
    %271 = vector.multi_reduction <maximumf>, %270, %cst_22 [0] : vector<8x128xf32> to vector<128xf32>
    %272 = vector.shape_cast %271 : vector<128xf32> to vector<1x128xf32>
    %273 = vector.broadcast %272 : vector<1x128xf32> to vector<8x128xf32>
    %274 = arith.subf %270, %273 : vector<8x128xf32>
    %275 = math.exp %274 : vector<8x128xf32>
    %276 = vector.extract_strided_slice %275 {offsets = [0, 0], sizes = [1, 128], strides = [1, 1]} : vector<8x128xf32> to vector<1x128xf32>
    %277 = vector.broadcast %276 : vector<1x128xf32> to vector<8x128xf32>
    %278 = arith.mulf %4, %277 : vector<8x128xf32>
    %279 = vector.extract_strided_slice %275 {offsets = [1, 0], sizes = [1, 128], strides = [1, 1]} : vector<8x128xf32> to vector<1x128xf32>
    %280 = vector.broadcast %279 : vector<1x128xf32> to vector<8x128xf32>
    %281 = arith.mulf %7, %280 : vector<8x128xf32>
    %282 = arith.addf %278, %281 : vector<8x128xf32>
    %283 = vector.extract_strided_slice %275 {offsets = [2, 0], sizes = [1, 128], strides = [1, 1]} : vector<8x128xf32> to vector<1x128xf32>
    %284 = vector.broadcast %283 : vector<1x128xf32> to vector<8x128xf32>
    %285 = arith.mulf %10, %284 : vector<8x128xf32>
    %286 = arith.addf %282, %285 : vector<8x128xf32>
    %287 = vector.extract_strided_slice %275 {offsets = [3, 0], sizes = [1, 128], strides = [1, 1]} : vector<8x128xf32> to vector<1x128xf32>
    %288 = vector.broadcast %287 : vector<1x128xf32> to vector<8x128xf32>
    %289 = arith.mulf %13, %288 : vector<8x128xf32>
    %290 = arith.addf %286, %289 : vector<8x128xf32>
    %291 = vector.extract_strided_slice %275 {offsets = [4, 0], sizes = [1, 128], strides = [1, 1]} : vector<8x128xf32> to vector<1x128xf32>
    %292 = vector.broadcast %291 : vector<1x128xf32> to vector<8x128xf32>
    %293 = arith.mulf %16, %292 : vector<8x128xf32>
    %294 = arith.addf %290, %293 : vector<8x128xf32>
    %295 = vector.extract_strided_slice %275 {offsets = [5, 0], sizes = [1, 128], strides = [1, 1]} : vector<8x128xf32> to vector<1x128xf32>
    %296 = vector.broadcast %295 : vector<1x128xf32> to vector<8x128xf32>
    %297 = arith.mulf %19, %296 : vector<8x128xf32>
    %298 = arith.addf %294, %297 : vector<8x128xf32>
    %299 = vector.extract_strided_slice %275 {offsets = [6, 0], sizes = [1, 128], strides = [1, 1]} : vector<8x128xf32> to vector<1x128xf32>
    %300 = vector.broadcast %299 : vector<1x128xf32> to vector<8x128xf32>
    %301 = arith.mulf %22, %300 : vector<8x128xf32>
    %302 = arith.addf %298, %301 : vector<8x128xf32>
    %303 = vector.extract_strided_slice %275 {offsets = [7, 0], sizes = [1, 128], strides = [1, 1]} : vector<8x128xf32> to vector<1x128xf32>
    %304 = vector.broadcast %303 : vector<1x128xf32> to vector<8x128xf32>
    %305 = arith.mulf %25, %304 : vector<8x128xf32>
    %306 = arith.addf %302, %305 : vector<8x128xf32>
    %307 = math.log %306 : vector<8x128xf32>
    %308 = vector.broadcast %272 : vector<1x128xf32> to vector<8x128xf32>
    %309 = arith.addf %308, %307 : vector<8x128xf32>
    %310 = arith.index_cast %c6_i32 : i32 to index
    %c0_23 = arith.constant 0 : index
    %c0_24 = arith.constant 0 : index
    %311 = vector.load %arg1[%310, %c0_23, %c0_24] : memref<8x8x128xf32, #tpu.memory_space<vmem>>, vector<1x8x128xf32>
    %312 = vector.shape_cast %311 : vector<1x8x128xf32> to vector<8x128xf32>
    %313 = arith.addf %309, %312 : vector<8x128xf32>
    %314 = vector.broadcast %c6_i32 : i32 to vector<1x128xi32>
    %315 = arith.cmpi slt, %314, %0 : vector<1x128xi32>
    %316 = vector.shape_cast %315 : vector<1x128xi1> to vector<1x128xi1>
    %317 = vector.broadcast %316 : vector<1x128xi1> to vector<8x128xi1>
    %318 = arith.select %317, %313, %270 : vector<8x128xi1>, vector<8x128xf32>
    %c7_i32 = arith.constant 7 : i32
    %cst_25 = arith.constant dense<0xFF800000> : vector<128xf32>
    %319 = vector.multi_reduction <maximumf>, %318, %cst_25 [0] : vector<8x128xf32> to vector<128xf32>
    %320 = vector.shape_cast %319 : vector<128xf32> to vector<1x128xf32>
    %321 = vector.broadcast %320 : vector<1x128xf32> to vector<8x128xf32>
    %322 = arith.subf %318, %321 : vector<8x128xf32>
    %323 = math.exp %322 : vector<8x128xf32>
    %324 = vector.extract_strided_slice %323 {offsets = [0, 0], sizes = [1, 128], strides = [1, 1]} : vector<8x128xf32> to vector<1x128xf32>
    %325 = vector.broadcast %324 : vector<1x128xf32> to vector<8x128xf32>
    %326 = arith.mulf %4, %325 : vector<8x128xf32>
    %327 = vector.extract_strided_slice %323 {offsets = [1, 0], sizes = [1, 128], strides = [1, 1]} : vector<8x128xf32> to vector<1x128xf32>
    %328 = vector.broadcast %327 : vector<1x128xf32> to vector<8x128xf32>
    %329 = arith.mulf %7, %328 : vector<8x128xf32>
    %330 = arith.addf %326, %329 : vector<8x128xf32>
    %331 = vector.extract_strided_slice %323 {offsets = [2, 0], sizes = [1, 128], strides = [1, 1]} : vector<8x128xf32> to vector<1x128xf32>
    %332 = vector.broadcast %331 : vector<1x128xf32> to vector<8x128xf32>
    %333 = arith.mulf %10, %332 : vector<8x128xf32>
    %334 = arith.addf %330, %333 : vector<8x128xf32>
    %335 = vector.extract_strided_slice %323 {offsets = [3, 0], sizes = [1, 128], strides = [1, 1]} : vector<8x128xf32> to vector<1x128xf32>
    %336 = vector.broadcast %335 : vector<1x128xf32> to vector<8x128xf32>
    %337 = arith.mulf %13, %336 : vector<8x128xf32>
    %338 = arith.addf %334, %337 : vector<8x128xf32>
    %339 = vector.extract_strided_slice %323 {offsets = [4, 0], sizes = [1, 128], strides = [1, 1]} : vector<8x128xf32> to vector<1x128xf32>
    %340 = vector.broadcast %339 : vector<1x128xf32> to vector<8x128xf32>
    %341 = arith.mulf %16, %340 : vector<8x128xf32>
    %342 = arith.addf %338, %341 : vector<8x128xf32>
    %343 = vector.extract_strided_slice %323 {offsets = [5, 0], sizes = [1, 128], strides = [1, 1]} : vector<8x128xf32> to vector<1x128xf32>
    %344 = vector.broadcast %343 : vector<1x128xf32> to vector<8x128xf32>
    %345 = arith.mulf %19, %344 : vector<8x128xf32>
    %346 = arith.addf %342, %345 : vector<8x128xf32>
    %347 = vector.extract_strided_slice %323 {offsets = [6, 0], sizes = [1, 128], strides = [1, 1]} : vector<8x128xf32> to vector<1x128xf32>
    %348 = vector.broadcast %347 : vector<1x128xf32> to vector<8x128xf32>
    %349 = arith.mulf %22, %348 : vector<8x128xf32>
    %350 = arith.addf %346, %349 : vector<8x128xf32>
    %351 = vector.extract_strided_slice %323 {offsets = [7, 0], sizes = [1, 128], strides = [1, 1]} : vector<8x128xf32> to vector<1x128xf32>
    %352 = vector.broadcast %351 : vector<1x128xf32> to vector<8x128xf32>
    %353 = arith.mulf %25, %352 : vector<8x128xf32>
    %354 = arith.addf %350, %353 : vector<8x128xf32>
    %355 = math.log %354 : vector<8x128xf32>
    %356 = vector.broadcast %320 : vector<1x128xf32> to vector<8x128xf32>
    %357 = arith.addf %356, %355 : vector<8x128xf32>
    %358 = arith.index_cast %c7_i32 : i32 to index
    %c0_26 = arith.constant 0 : index
    %c0_27 = arith.constant 0 : index
    %359 = vector.load %arg1[%358, %c0_26, %c0_27] : memref<8x8x128xf32, #tpu.memory_space<vmem>>, vector<1x8x128xf32>
    %360 = vector.shape_cast %359 : vector<1x8x128xf32> to vector<8x128xf32>
    %361 = arith.addf %357, %360 : vector<8x128xf32>
    %362 = vector.broadcast %c7_i32 : i32 to vector<1x128xi32>
    %363 = arith.cmpi slt, %362, %0 : vector<1x128xi32>
    %364 = vector.shape_cast %363 : vector<1x128xi1> to vector<1x128xi1>
    %365 = vector.broadcast %364 : vector<1x128xi1> to vector<8x128xi1>
    %366 = arith.select %365, %361, %318 : vector<8x128xi1>, vector<8x128xf32>
    %c7_i32_28 = arith.constant 7 : i32
    %c0_29 = arith.constant 0 : index
    %c0_30 = arith.constant 0 : index
    %367 = vector.load %arg5[%c0_29, %c0_30] : memref<8x1xf32, #tpu.memory_space<vmem>>, vector<8x1xf32>
    %368 = vector.broadcast %367 : vector<8x1xf32> to vector<8x128xf32>
    %369 = arith.addf %366, %368 : vector<8x128xf32>
    %cst_31 = arith.constant dense<0xFF800000> : vector<128xf32>
    %370 = vector.multi_reduction <maximumf>, %369, %cst_31 [0] : vector<8x128xf32> to vector<128xf32>
    %371 = vector.shape_cast %370 : vector<128xf32> to vector<1x128xf32>
    %372 = vector.broadcast %371 : vector<1x128xf32> to vector<8x128xf32>
    %373 = arith.subf %369, %372 : vector<8x128xf32>
    %374 = math.exp %373 : vector<8x128xf32>
    %cst_32 = arith.constant dense<0.000000e+00> : vector<128xf32>
    %375 = vector.multi_reduction <add>, %374, %cst_32 [0] : vector<8x128xf32> to vector<128xf32>
    %376 = vector.shape_cast %375 : vector<128xf32> to vector<1x128xf32>
    %377 = math.log %376 : vector<1x128xf32>
    %378 = arith.addf %371, %377 : vector<1x128xf32>
    %c0_33 = arith.constant 0 : index
    %c0_34 = arith.constant 0 : index
    %379 = vector.load %arg6[%c0_33, %c0_34] : memref<1x128xf32, #tpu.memory_space<vmem>>, vector<1x128xf32>
    tpu.vector_store %arg6[%c0_33, %c0_34], %378 {strides = array<i32>} : memref<1x128xf32, #tpu.memory_space<vmem>>, vector<1x128xf32>,
    return
  }
  func.func @transform_0(%arg0: i32) -> (i32, i32, i32) {
    %c0_i32 = arith.constant 0 : i32
    %c0_i32_0 = arith.constant 0 : i32
    %c0_i32_1 = arith.constant 0 : i32
    return %c0_i32, %c0_i32_0, %arg0 : i32, i32, i32
  }
  func.func @transform_1(%arg0: i32) -> (i32, i32) {
    %c0_i32 = arith.constant 0 : i32
    %c0_i32_0 = arith.constant 0 : i32
    return %c0_i32, %arg0 : i32, i32
  }
  func.func @transform_2(%arg0: i32) -> (i32, i32) {
    %c0_i32 = arith.constant 0 : i32
    %c0_i32_0 = arith.constant 0 : i32
    %c0_i32_1 = arith.constant 0 : i32
    return %c0_i32, %c0_i32_0 : i32, i32
  }
  func.func @transform_3(%arg0: i32) -> (i32, i32) {
    %c0_i32 = arith.constant 0 : i32
    %c0_i32_0 = arith.constant 0 : i32
    %c0_i32_1 = arith.constant 0 : i32
    return %c0_i32, %c0_i32_0 : i32, i32
  }
  func.func @transform_4(%arg0: i32) -> (i32, i32) {
    %c0_i32 = arith.constant 0 : i32
    %c0_i32_0 = arith.constant 0 : i32
    %c0_i32_1 = arith.constant 0 : i32
    return %c0_i32, %c0_i32_0 : i32, i32
  }
  func.func @transform_5(%arg0: i32) -> (i32, i32) {
    %c0_i32 = arith.constant 0 : i32
    %c0_i32_0 = arith.constant 0 : i32
    return %c0_i32, %arg0 : i32, i32
  }
}

</mosaic_0001>

<bundles_post_ra>
// kernel: batch_crf_nll.1
= control target key start
LH: loop header
LB: loop body
LE: loop exit
PB: predicated region body
PF: predicated region fallthrough
CT: control target
= control target key end

     0   :  { %v640_v0 = vmov 0   ;;  %v641_v3 = vmov 1   ;;  %v642_v4 = vmov 2   ;;  %v643_v5 = vmov 3   ;;  %s893_s3 = inlined_call_operand.vmem [shape: f32[8,1], index: 3, kind: input, shape index: {}]   ;;  %s894_s2 = inlined_call_operand.vmem [shape: f32[8,8], index: 2, kind: input, shape index: {}]   ;;  %s895_s0 = inlined_call_operand.vmem [shape: f32[8,8,128], index: 0, kind: input, shape index: {}]   ;;  %s896_s1 = inlined_call_operand.vmem [shape: s32[1,128], index: 1, kind: input, shape index: {}]   ;;  %s897_s4 = inlined_call_operand.vmem [shape: f32[8,1], index: 4, kind: input, shape index: {}]   ;;  %s898_s5 = inlined_call_operand.vmem [shape: f32[1,128], index: 5, kind: output, shape index: {}]  }
   0x1   :  { %598 = vset.pattern.permute.xlu0 %v640_v0  ;;  %v55_v1 = vld [vmem:[%s893_s3] sm:$0xff]  ;;  %599 = vset.pattern.permute.xlu1 %v641_v3  ;;  %v644_v6 = vmov 4   ;;  %v645_v7 = vmov 6   ;;  %v646_v8 = vmov 5   ;;  %v647_v9 = vmov 7  }
   0x2   :  { %v21_v2 = vld [vmem:[%s894_s2] sm:$0xff]  ;;  %59 = vperm.xlu0 %598, %v55_v1   ;;  %v72_v22 = vlaneseq }
   0x3   :  { %28 = vperm.xlu1 %599, %v21_v2   ;;  %v56_v10 = vld [vmem:[%s895_s0] sm:$0xff] }
   0x4   :  { %v73_v23 = vshrl.u32 %v72_v22, 7  ;;  %v746_v63 = vld [vmem:[%s896_s1] sm:$0x1] }
   0x5   :  { %vm125_vm0 = vcmp.gt.s32.totalorder %v746_v63, 1  ;;  %vm195_vm2 = vcmp.gt.s32.totalorder %v746_v63, 2  ;;  %vm265_vm4 = vcmp.gt.s32.totalorder %v746_v63, 3  ;;  %vm335_vm6 = vcmp.gt.s32.totalorder %v746_v63, 4 }
   0x6   :  { %24 = vperm.xlu0 %598, %v21_v2   ;;  %v699_v25 = vsub.s32 0, %v73_v23  ;;  %v701_v26 = vsub.s32 1, %v73_v23  ;;  %v703_v27 = vsub.s32 2, %v73_v23  ;;  %v705_v28 = vsub.s32 3, %v73_v23 }
   0x7   :  { %600 = vset.pattern.permute.xlu1 %v642_v4  ;;  %v714_v35 = vsub.s32 4, %v73_v23  ;;  %v718_v38 = vsub.s32 5, %v73_v23  ;;  %v725_v44 = vsub.s32 6, %v73_v23  ;;  %v731_v49 = vsub.s32 7, %v73_v23 }
   0x8   :  { %32 = vperm.xlu1 %600, %v21_v2   ;;  %v126_v1 = vsel %vm125_vm0, 1, %v640_v0  ;;  %vm405_vm8 = vcmp.gt.s32.totalorder %v746_v63, 5  ;;  %vm475_vm10 = vcmp.gt.s32.totalorder %v746_v63, 6  ;;  %vm545_vm12 = vcmp.gt.s32.totalorder %v746_v63, 7 }
   0x9   :  { %v130_v3 = vrot.slane %v126_v1, %v699_v25 }
   0xa   :  { %601 = vset.pattern.permute.xlu0 %v643_v5  ;;  %v583_v5 = vld [vmem:[%s895_s0 + $0x8] sm:$0xff] }
   0xb   :  { %36 = vperm.xlu0 %601, %v21_v2   ;;  %vm131_vm1 = vcmp.eq.s32.totalorder %v130_v3, 1 }
   0xc   :  { %602 = vset.pattern.permute.xlu1 %v644_v6 }
   0xd   :  { %40 = vperm.xlu1 %602, %v21_v2  }
   0xf   :  { %604 = vset.pattern.permute.xlu0 %v645_v7 }
  0x10   :  { %48 = vperm.xlu0 %604, %v21_v2  }
  0x11   :  { %603 = vset.pattern.permute.xlu1 %v646_v8 }
  0x12   :  { %44 = vperm.xlu1 %603, %v21_v2  }
  0x14   :  { %607 = vset.pattern.permute.xlu0 %v640_v0 }
  0x16   :  { %605 = vset.pattern.permute.xlu1 %v647_v9 }
  0x17   :  { %52 = vperm.xlu1 %605, %v21_v2  }
  0x1b   :  { %606 = vset.pattern.permute.xlu1 %v640_v0 }
  0x81   :  { %v60_v11 = vpop.permute.xlu0 %59 }
  0x82   :  { %v690_v12 = vadd.f32 %v60_v11, %v56_v10  ;;  %v695_v21 = vpop.permute.xlu1 %28 }
  0x84   :  { %v63_v13 = vrot.slane %v690_v12, 4 }
  0x85   :  { %v707_v30 = vpop.permute.xlu0 %24 }
  0x86   :  { %v64_v14 = vmax.f32 %v690_v12, %v63_v13 }
  0x87   :  { %v697_v24 = vpop.permute.xlu1 %32 }
  0x88   :  { %v65_v15 = vrot.slane %v64_v14, 2 }
  0x8a   :  { %v66_v16 = vmax.f32 %v64_v14, %v65_v15  ;;  %v721_v40 = vpop.permute.xlu0 %36 }
  0x8c   :  { %v67_v17 = vrot.slane %v66_v16, 1  ;;  %v709_v31 = vpop.permute.xlu1 %40 }
  0x8e   :  { %v68_v18 = vmax.f32 %v66_v16, %v67_v17 }
  0x8f   :  { %v735_v53 = vpop.permute.xlu0 %48 }
  0x90   :  { %v69_v19 = vsub.f32 %v690_v12, %v68_v18 }
  0x91   :  { %v727_v45 = vpop.permute.xlu1 %44 }
  0x92   :  { %v70_v20 = vmul.f32 1.442695, %v69_v19 }
  0x94   :  { %608 = vpow2.f32 %v70_v20 }
  0x96   :  { %v739_v57 = vpop.permute.xlu1 %52 }
  0x9e   :  { %v609_v29 = vpop.eup %608 }
  0x9f   :  { %v75_v32 = vrot.slane %v609_v29, %v699_v25  ;;  %v80_v33 = vrot.slane %v609_v29, %v701_v26  ;;  %v86_v34 = vrot.slane %v609_v29, %v703_v27  ;;  %v92_v39 = vrot.slane %v609_v29, %v705_v28 }
  0xa0   :  { %v98_v43 = vrot.slane %v609_v29, %v714_v35  ;;  %v104_v47 = vrot.slane %v609_v29, %v718_v38  ;;  %v110_v52 = vrot.slane %v609_v29, %v725_v44  ;;  %v116_v55 = vrot.slane %v609_v29, %v731_v49 }
  0xa1   :  { %v76_v36 = vmul.f32 %v75_v32, %v707_v30  ;;  %v81_v37 = vmul.f32 %v80_v33, %v695_v21  ;;  %v87_v42 = vmul.f32 %v86_v34, %v697_v24  ;;  %v93_v48 = vmul.f32 %v92_v39, %v721_v40 }
  0xa2   :  { %v99_v50 = vmul.f32 %v98_v43, %v709_v31  ;;  %v105_v54 = vmul.f32 %v104_v47, %v727_v45  ;;  %v111_v59 = vmul.f32 %v110_v52, %v735_v53  ;;  %v117_v60 = vmul.f32 %v116_v55, %v739_v57 }
  0xa3   :  { %v82_v41 = vadd.f32 %v81_v37, %v76_v36 }
  0xa5   :  { %v88_v46 = vadd.f32 %v87_v42, %v82_v41 }
  0xa7   :  { %v94_v51 = vadd.f32 %v93_v48, %v88_v46 }
  0xa9   :  { %v100_v56 = vadd.f32 %v99_v50, %v94_v51 }
  0xab   :  { %v106_v58 = vadd.f32 %v105_v54, %v100_v56  ;;  %v196_v56 = vsel %vm195_vm2, 1, %v640_v0 }
  0xad   :  { %v112_v61 = vadd.f32 %v111_v59, %v106_v58  ;;  %v200_v59 = vrot.slane %v196_v56, %v699_v25 }
  0xaf   :  { %v118_v62 = vadd.f32 %v117_v60, %v112_v61  ;;  %v584_v61 = vld [vmem:[%s895_s0 + $0x10] sm:$0xff]  ;;  %vm201_vm3 = vcmp.eq.s32.totalorder %v200_v59, 1 }
  0xb1   :  { %610 = vlog2.f32 %v118_v62 }
  0xbb   :  { %v611_v2 = vpop.eup %610 }
  0xbc   :  { %v120_v4 = vmul.f32 0.6931472, %v611_v2 }
  0xbe   :  { %v121_v6 = vadd.f32 %v120_v4, %v68_v18 }
  0xc0   :  { %v124_v7 = vadd.f32 %v583_v5, %v121_v6 }
  0xc2   :  { %v132_v8 = vsel %vm131_vm1, %v124_v7, %v690_v12 }
  0xc3   :  { %v133_v9 = vrot.slane %v132_v8, 4 }
  0xc5   :  { %v134_v10 = vmax.f32 %v132_v8, %v133_v9 }
  0xc7   :  { %v135_v11 = vrot.slane %v134_v10, 2 }
  0xc9   :  { %v136_v13 = vmax.f32 %v134_v10, %v135_v11 }
  0xcb   :  { %v137_v14 = vrot.slane %v136_v13, 1 }
  0xcd   :  { %v138_v15 = vmax.f32 %v136_v13, %v137_v14 }
  0xcf   :  { %v139_v16 = vsub.f32 %v132_v8, %v138_v15 }
  0xd1   :  { %v140_v17 = vmul.f32 1.442695, %v139_v16 }
  0xd3   :  { %612 = vpow2.f32 %v140_v17 }
  0xdd   :  { %v613_v19 = vpop.eup %612 }
  0xde   :  { %v145_v20 = vrot.slane %v613_v19, %v699_v25  ;;  %v150_v22 = vrot.slane %v613_v19, %v701_v26  ;;  %v156_v18 = vrot.slane %v613_v19, %v703_v27  ;;  %v162_v29 = vrot.slane %v613_v19, %v705_v28 }
  0xdf   :  { %v168_v34 = vrot.slane %v613_v19, %v714_v35  ;;  %v174_v39 = vrot.slane %v613_v19, %v718_v38  ;;  %v180_v43 = vrot.slane %v613_v19, %v725_v44  ;;  %v186_v48 = vrot.slane %v613_v19, %v731_v49 }
  0xe0   :  { %v146_v23 = vmul.f32 %v145_v20, %v707_v30  ;;  %v151_v12 = vmul.f32 %v150_v22, %v695_v21  ;;  %v157_v33 = vmul.f32 %v156_v18, %v697_v24  ;;  %v163_v37 = vmul.f32 %v162_v29, %v721_v40 }
  0xe1   :  { %v169_v42 = vmul.f32 %v168_v34, %v709_v31  ;;  %v175_v47 = vmul.f32 %v174_v39, %v727_v45  ;;  %v181_v51 = vmul.f32 %v180_v43, %v735_v53  ;;  %v187_v54 = vmul.f32 %v186_v48, %v739_v57  ;;  %v553_v48 = vld [vmem:[%s897_s4] sm:$0xff] }
  0xe2   :  { %v152_v32 = vadd.f32 %v151_v12, %v146_v23  ;;  %556 = vperm.xlu1 %606, %v553_v48  }
  0xe4   :  { %v158_v36 = vadd.f32 %v157_v33, %v152_v32 }
  0xe6   :  { %v164_v41 = vadd.f32 %v163_v37, %v158_v36 }
  0xe8   :  { %v170_v46 = vadd.f32 %v169_v42, %v164_v41 }
  0xea   :  { %v176_v50 = vadd.f32 %v175_v47, %v170_v46 }
  0xec   :  { %v182_v52 = vadd.f32 %v181_v51, %v176_v50  ;;  %v266_v50 = vsel %vm265_vm4, 1, %v640_v0 }
  0xee   :  { %v188_v55 = vadd.f32 %v187_v54, %v182_v52  ;;  %v270_v52 = vrot.slane %v266_v50, %v699_v25 }
  0xf0   :  { %614 = vlog2.f32 %v188_v55  ;;  %v585_v55 = vld [vmem:[%s895_s0 + $0x18] sm:$0xff]  ;;  %vm271_vm5 = vcmp.eq.s32.totalorder %v270_v52, 1 }
  0xfa   :  { %v615_v58 = vpop.eup %614 }
  0xfb   :  { %v190_v60 = vmul.f32 0.6931472, %v615_v58 }
  0xfd   :  { %v191_v62 = vadd.f32 %v190_v60, %v138_v15 }
  0xff   :  { %v194_v1 = vadd.f32 %v584_v61, %v191_v62 }
 0x101   :  { %v202_v2 = vsel %vm201_vm3, %v194_v1, %v132_v8 }
 0x102   :  { %v203_v3 = vrot.slane %v202_v2, 4 }
 0x104   :  { %v204_v4 = vmax.f32 %v202_v2, %v203_v3 }
 0x106   :  { %v205_v5 = vrot.slane %v204_v4, 2 }
 0x108   :  { %v206_v6 = vmax.f32 %v204_v4, %v205_v5 }
 0x10a   :  { %v207_v7 = vrot.slane %v206_v6, 1 }
 0x10c   :  { %v208_v9 = vmax.f32 %v206_v6, %v207_v7 }
 0x10e   :  { %v209_v10 = vsub.f32 %v202_v2, %v208_v9 }
 0x110   :  { %v210_v11 = vmul.f32 1.442695, %v209_v10 }
 0x112   :  { %616 = vpow2.f32 %v210_v11 }
 0x11c   :  { %v617_v13 = vpop.eup %616 }
 0x11d   :  { %v215_v14 = vrot.slane %v617_v13, %v699_v25  ;;  %v220_v16 = vrot.slane %v617_v13, %v701_v26  ;;  %v226_v17 = vrot.slane %v617_v13, %v703_v27  ;;  %v232_v19 = vrot.slane %v617_v13, %v705_v28 }
 0x11e   :  { %v238_v18 = vrot.slane %v617_v13, %v714_v35  ;;  %v244_v29 = vrot.slane %v617_v13, %v718_v38  ;;  %v250_v34 = vrot.slane %v617_v13, %v725_v44  ;;  %v256_v39 = vrot.slane %v617_v13, %v731_v49 }
 0x11f   :  { %v216_v15 = vmul.f32 %v215_v14, %v707_v30  ;;  %v221_v8 = vmul.f32 %v220_v16, %v695_v21  ;;  %v227_v22 = vmul.f32 %v226_v17, %v697_v24  ;;  %v233_v12 = vmul.f32 %v232_v19, %v721_v40 }
 0x120   :  { %v239_v33 = vmul.f32 %v238_v18, %v709_v31  ;;  %v245_v37 = vmul.f32 %v244_v29, %v727_v45  ;;  %v251_v42 = vmul.f32 %v250_v34, %v735_v53  ;;  %v257_v46 = vmul.f32 %v256_v39, %v739_v57 }
 0x121   :  { %v222_v20 = vadd.f32 %v221_v8, %v216_v15 }
 0x123   :  { %v228_v23 = vadd.f32 %v227_v22, %v222_v20 }
 0x125   :  { %v234_v32 = vadd.f32 %v233_v12, %v228_v23 }
 0x127   :  { %v240_v36 = vadd.f32 %v239_v33, %v234_v32 }
 0x129   :  { %v246_v41 = vadd.f32 %v245_v37, %v240_v36 }
 0x12b   :  { %v252_v43 = vadd.f32 %v251_v42, %v246_v41  ;;  %v336_v41 = vsel %vm335_vm6, 1, %v640_v0 }
 0x12d   :  { %v258_v47 = vadd.f32 %v257_v46, %v252_v43  ;;  %v340_v43 = vrot.slane %v336_v41, %v699_v25 }
 0x12f   :  { %618 = vlog2.f32 %v258_v47  ;;  %v586_v47 = vld [vmem:[%s895_s0 + $0x20] sm:$0xff]  ;;  %vm341_vm7 = vcmp.eq.s32.totalorder %v340_v43, 1 }
 0x139   :  { %v619_v51 = vpop.eup %618 }
 0x13a   :  { %v260_v54 = vmul.f32 0.6931472, %v619_v51 }
 0x13c   :  { %v261_v56 = vadd.f32 %v260_v54, %v208_v9 }
 0x13e   :  { %v264_v58 = vadd.f32 %v585_v55, %v261_v56 }
 0x140   :  { %v272_v59 = vsel %vm271_vm5, %v264_v58, %v202_v2 }
 0x141   :  { %v273_v60 = vrot.slane %v272_v59, 4 }
 0x143   :  { %v274_v61 = vmax.f32 %v272_v59, %v273_v60 }
 0x145   :  { %v275_v62 = vrot.slane %v274_v61, 2 }
 0x147   :  { %v276_v1 = vmax.f32 %v274_v61, %v275_v62 }
 0x149   :  { %v277_v3 = vrot.slane %v276_v1, 1 }
 0x14b   :  { %v278_v4 = vmax.f32 %v276_v1, %v277_v3 }
 0x14d   :  { %v279_v5 = vsub.f32 %v272_v59, %v278_v4 }
 0x14f   :  { %v280_v6 = vmul.f32 1.442695, %v279_v5 }
 0x151   :  { %620 = vpow2.f32 %v280_v6 }
 0x15b   :  { %v621_v7 = vpop.eup %620 }
 0x15c   :  { %v285_v10 = vrot.slane %v621_v7, %v699_v25  ;;  %v290_v11 = vrot.slane %v621_v7, %v701_v26  ;;  %v296_v13 = vrot.slane %v621_v7, %v703_v27  ;;  %v302_v14 = vrot.slane %v621_v7, %v705_v28 }
 0x15d   :  { %v308_v15 = vrot.slane %v621_v7, %v714_v35  ;;  %v314_v20 = vrot.slane %v621_v7, %v718_v38  ;;  %v320_v23 = vrot.slane %v621_v7, %v725_v44  ;;  %v326_v32 = vrot.slane %v621_v7, %v731_v49 }
 0x15e   :  { %v286_v9 = vmul.f32 %v285_v10, %v707_v30  ;;  %v291_v2 = vmul.f32 %v290_v11, %v695_v21  ;;  %v297_v17 = vmul.f32 %v296_v13, %v697_v24  ;;  %v303_v19 = vmul.f32 %v302_v14, %v721_v40 }
 0x15f   :  { %v309_v18 = vmul.f32 %v308_v15, %v709_v31  ;;  %v315_v29 = vmul.f32 %v314_v20, %v727_v45  ;;  %v321_v34 = vmul.f32 %v320_v23, %v735_v53  ;;  %v327_v37 = vmul.f32 %v326_v32, %v739_v57 }
 0x160   :  { %v292_v16 = vadd.f32 %v291_v2, %v286_v9  ;;  %v406_v32 = vsel %vm405_vm8, 1, %v640_v0 }
 0x162   :  { %v298_v8 = vadd.f32 %v297_v17, %v292_v16 }
 0x164   :  { %v304_v22 = vadd.f32 %v303_v19, %v298_v8 }
 0x166   :  { %v310_v12 = vadd.f32 %v309_v18, %v304_v22 }
 0x168   :  { %v316_v33 = vadd.f32 %v315_v29, %v310_v12 }
 0x16a   :  { %v322_v36 = vadd.f32 %v321_v34, %v316_v33  ;;  %v410_v34 = vrot.slane %v406_v32, %v699_v25 }
 0x16c   :  { %v328_v39 = vadd.f32 %v327_v37, %v322_v36  ;;  %v587_v37 = vld [vmem:[%s895_s0 + $0x28] sm:$0xff]  ;;  %vm411_vm9 = vcmp.eq.s32.totalorder %v410_v34, 1 }
 0x16e   :  { %622 = vlog2.f32 %v328_v39 }
 0x178   :  { %v623_v42 = vpop.eup %622 }
 0x179   :  { %v330_v46 = vmul.f32 0.6931472, %v623_v42 }
 0x17b   :  { %v331_v48 = vadd.f32 %v330_v46, %v278_v4 }
 0x17d   :  { %v334_v50 = vadd.f32 %v586_v47, %v331_v48 }
 0x17f   :  { %v342_v51 = vsel %vm341_vm7, %v334_v50, %v272_v59 }
 0x180   :  { %v343_v52 = vrot.slane %v342_v51, 4 }
 0x182   :  { %v344_v54 = vmax.f32 %v342_v51, %v343_v52 }
 0x184   :  { %v345_v55 = vrot.slane %v344_v54, 2 }
 0x186   :  { %v346_v56 = vmax.f32 %v344_v54, %v345_v55 }
 0x188   :  { %v347_v58 = vrot.slane %v346_v56, 1 }
 0x18a   :  { %v348_v60 = vmax.f32 %v346_v56, %v347_v58 }
 0x18c   :  { %v349_v61 = vsub.f32 %v342_v51, %v348_v60 }
 0x18e   :  { %v350_v62 = vmul.f32 1.442695, %v349_v61 }
 0x190   :  { %624 = vpow2.f32 %v350_v62 }
 0x19a   :  { %v625_v1 = vpop.eup %624 }
 0x19b   :  { %v355_v3 = vrot.slane %v625_v1, %v699_v25  ;;  %v360_v5 = vrot.slane %v625_v1, %v701_v26  ;;  %v366_v6 = vrot.slane %v625_v1, %v703_v27  ;;  %v372_v7 = vrot.slane %v625_v1, %v705_v28 }
 0x19c   :  { %v378_v13 = vrot.slane %v625_v1, %v714_v35  ;;  %v384_v14 = vrot.slane %v625_v1, %v718_v38  ;;  %v390_v15 = vrot.slane %v625_v1, %v725_v44  ;;  %v396_v20 = vrot.slane %v625_v1, %v731_v49 }
 0x19d   :  { %v356_v4 = vmul.f32 %v355_v3, %v707_v30  ;;  %v361_v59 = vmul.f32 %v360_v5, %v695_v21  ;;  %v367_v11 = vmul.f32 %v366_v6, %v697_v24  ;;  %v373_v2 = vmul.f32 %v372_v7, %v721_v40 }
 0x19e   :  { %v379_v17 = vmul.f32 %v378_v13, %v709_v31  ;;  %v385_v19 = vmul.f32 %v384_v14, %v727_v45  ;;  %v391_v18 = vmul.f32 %v390_v15, %v735_v53  ;;  %v397_v12 = vmul.f32 %v396_v20, %v739_v57 }
 0x19f   :  { %v362_v10 = vadd.f32 %v361_v59, %v356_v4  ;;  %v476_v20 = vsel %vm475_vm10, 1, %v640_v0 }
 0x1a1   :  { %v368_v9 = vadd.f32 %v367_v11, %v362_v10 }
 0x1a3   :  { %v374_v16 = vadd.f32 %v373_v2, %v368_v9 }
 0x1a5   :  { %v380_v8 = vadd.f32 %v379_v17, %v374_v16 }
 0x1a7   :  { %v386_v22 = vadd.f32 %v385_v19, %v380_v8 }
 0x1a9   :  { %v392_v23 = vadd.f32 %v391_v18, %v386_v22  ;;  %v480_v18 = vrot.slane %v476_v20, %v699_v25 }
 0x1ab   :  { %v398_v29 = vadd.f32 %v397_v12, %v392_v23  ;;  %v588_v12 = vld [vmem:[%s895_s0 + $0x30] sm:$0xff]  ;;  %vm481_vm11 = vcmp.eq.s32.totalorder %v480_v18, 1 }
 0x1ad   :  { %626 = vlog2.f32 %v398_v29 }
 0x1b7   :  { %v627_v33 = vpop.eup %626 }
 0x1b8   :  { %v400_v36 = vmul.f32 0.6931472, %v627_v33 }
 0x1ba   :  { %v401_v39 = vadd.f32 %v400_v36, %v348_v60 }
 0x1bc   :  { %v404_v41 = vadd.f32 %v587_v37, %v401_v39 }
 0x1be   :  { %v412_v42 = vsel %vm411_vm9, %v404_v41, %v342_v51 }
 0x1bf   :  { %v413_v43 = vrot.slane %v412_v42, 4 }
 0x1c1   :  { %v414_v46 = vmax.f32 %v412_v42, %v413_v43 }
 0x1c3   :  { %v415_v47 = vrot.slane %v414_v46, 2 }
 0x1c5   :  { %v416_v48 = vmax.f32 %v414_v46, %v415_v47 }
 0x1c7   :  { %v417_v50 = vrot.slane %v416_v48, 1 }
 0x1c9   :  { %v418_v52 = vmax.f32 %v416_v48, %v417_v50 }
 0x1cb   :  { %v419_v54 = vsub.f32 %v412_v42, %v418_v52 }
 0x1cd   :  { %v420_v55 = vmul.f32 1.442695, %v419_v54 }
 0x1cf   :  { %628 = vpow2.f32 %v420_v55 }
 0x1d9   :  { %v629_v56 = vpop.eup %628 }
 0x1da   :  { %v425_v58 = vrot.slane %v629_v56, %v699_v25  ;;  %v430_v61 = vrot.slane %v629_v56, %v701_v26  ;;  %v436_v62 = vrot.slane %v629_v56, %v703_v27  ;;  %v442_v1 = vrot.slane %v629_v56, %v705_v28 }
 0x1db   :  { %v448_v6 = vrot.slane %v629_v56, %v714_v35  ;;  %v454_v7 = vrot.slane %v629_v56, %v718_v38  ;;  %v460_v13 = vrot.slane %v629_v56, %v725_v44  ;;  %v466_v14 = vrot.slane %v629_v56, %v731_v49 }
 0x1dc   :  { %v426_v60 = vmul.f32 %v425_v58, %v707_v30  ;;  %v431_v51 = vmul.f32 %v430_v61, %v695_v21  ;;  %v437_v5 = vmul.f32 %v436_v62, %v697_v24  ;;  %v443_v59 = vmul.f32 %v442_v1, %v721_v40 }
 0x1dd   :  { %v449_v11 = vmul.f32 %v448_v6, %v709_v31  ;;  %v455_v2 = vmul.f32 %v454_v7, %v727_v45  ;;  %v461_v17 = vmul.f32 %v460_v13, %v735_v53  ;;  %v467_v8 = vmul.f32 %v466_v14, %v739_v57 }
 0x1de   :  { %v432_v3 = vadd.f32 %v431_v51, %v426_v60 }
 0x1e0   :  { %v438_v4 = vadd.f32 %v437_v5, %v432_v3 }
 0x1e2   :  { %v444_v10 = vadd.f32 %v443_v59, %v438_v4 }
 0x1e4   :  { %v450_v9 = vadd.f32 %v449_v11, %v444_v10 }
 0x1e6   :  { %v456_v16 = vadd.f32 %v455_v2, %v450_v9 }
 0x1e8   :  { %v462_v15 = vadd.f32 %v461_v17, %v456_v16 }
 0x1ea   :  { %v468_v19 = vadd.f32 %v467_v8, %v462_v15 }
 0x1ec   :  { %630 = vlog2.f32 %v468_v19 }
 0x1f6   :  { %v631_v22 = vpop.eup %630 }
 0x1f7   :  { %v470_v23 = vmul.f32 0.6931472, %v631_v22 }
 0x1f9   :  { %v471_v29 = vadd.f32 %v470_v23, %v418_v52 }
 0x1fb   :  { %v474_v32 = vadd.f32 %v588_v12, %v471_v29 }
 0x1fd   :  { %v482_v33 = vsel %vm481_vm11, %v474_v32, %v412_v42 }
 0x1fe   :  { %v483_v34 = vrot.slane %v482_v33, 4 }
 0x200   :  { %v484_v36 = vmax.f32 %v482_v33, %v483_v34 }
 0x202   :  { %v485_v37 = vrot.slane %v484_v36, 2 }
 0x204   :  { %v486_v39 = vmax.f32 %v484_v36, %v485_v37 }
 0x206   :  { %v487_v41 = vrot.slane %v486_v39, 1 }
 0x208   :  { %v488_v43 = vmax.f32 %v486_v39, %v487_v41 }
 0x20a   :  { %v489_v46 = vsub.f32 %v482_v33, %v488_v43 }
 0x20c   :  { %v490_v47 = vmul.f32 1.442695, %v489_v46 }
 0x20e   :  { %632 = vpow2.f32 %v490_v47 }
 0x218   :  { %v633_v48 = vpop.eup %632 }
 0x219   :  { %v495_v50 = vrot.slane %v633_v48, %v699_v25  ;;  %v500_v54 = vrot.slane %v633_v48, %v701_v26  ;;  %v506_v55 = vrot.slane %v633_v48, %v703_v27  ;;  %v512_v56 = vrot.slane %v633_v48, %v705_v28 }
 0x21a   :  { %v518_v62 = vrot.slane %v633_v48, %v714_v35  ;;  %v524_v1 = vrot.slane %v633_v48, %v718_v38  ;;  %v530_v27 = vrot.slane %v633_v48, %v725_v44  ;;  %v536_v28 = vrot.slane %v633_v48, %v731_v49 }
 0x21b   :  { %v496_v52 = vmul.f32 %v495_v50, %v707_v30  ;;  %v501_v42 = vmul.f32 %v500_v54, %v695_v21  ;;  %v507_v61 = vmul.f32 %v506_v55, %v697_v24  ;;  %v513_v51 = vmul.f32 %v512_v56, %v721_v40 }
 0x21c   :  { %v519_v26 = vmul.f32 %v518_v62, %v709_v31  ;;  %v525_v21 = vmul.f32 %v524_v1, %v727_v45  ;;  %v531_v24 = vmul.f32 %v530_v27, %v735_v53  ;;  %v537_v35 = vmul.f32 %v536_v28, %v739_v57  ;;  %v589_v45 = vld [vmem:[%s895_s0 + $0x38] sm:$0xff]  ;;  %v557_v53 = vpop.permute.xlu1 %556 }
 0x21d   :  { %v502_v58 = vadd.f32 %v501_v42, %v496_v52  ;;  %v546_v38 = vsel %vm545_vm12, 1, %v640_v0 }
 0x21e   :  { %v550_v40 = vrot.slane %v546_v38, %v699_v25 }
 0x21f   :  { %v508_v60 = vadd.f32 %v507_v61, %v502_v58 }
 0x220   :  { %vm551_vm13 = vcmp.eq.s32.totalorder %v550_v40, 1 }
 0x221   :  { %v514_v3 = vadd.f32 %v513_v51, %v508_v60 }
 0x223   :  { %v520_v30 = vadd.f32 %v519_v26, %v514_v3 }
 0x225   :  { %v526_v5 = vadd.f32 %v525_v21, %v520_v30 }
 0x227   :  { %v532_v6 = vadd.f32 %v531_v24, %v526_v5 }
 0x229   :  { %v538_v4 = vadd.f32 %v537_v35, %v532_v6 }
 0x22b   :  { %634 = vlog2.f32 %v538_v4 }
 0x235   :  { %v635_v31 = vpop.eup %634 }
 0x236   :  { %v540_v44 = vmul.f32 0.6931472, %v635_v31 }
 0x238   :  { %v541_v49 = vadd.f32 %v540_v44, %v488_v43 }
 0x23a   :  { %v544_v59 = vadd.f32 %v589_v45, %v541_v49 }
 0x23c   :  { %v552_v7 = vsel %vm551_vm13, %v544_v59, %v482_v33 }
 0x23d   :  { %v559_v57 = vadd.f32 %v557_v53, %v552_v7 }
 0x23f   :  { %v560_v10 = vrot.slane %v559_v57, 4 }
 0x241   :  { %v561_v11 = vmax.f32 %v559_v57, %v560_v10 }
 0x243   :  { %v562_v13 = vrot.slane %v561_v11, 2 }
 0x245   :  { %v563_v63 = vmax.f32 %v561_v11, %v562_v13 }
 0x247   :  { %v564_v9 = vrot.slane %v563_v63, 1 }
 0x249   :  { %v565_v0 = vmax.f32 %v563_v63, %v564_v9 }
 0x24b   :  { %v566_v2 = vsub.f32 %v559_v57, %v565_v0 }
 0x24d   :  { %v567_v14 = vmul.f32 1.442695, %v566_v2 }
 0x24f   :  { %636 = vpow2.f32 %v567_v14 }
 0x259   :  { %v637_v25 = vpop.eup %636 }
 0x25a   :  { %v569_v16 = vrot.slane %v637_v25, 4 }
 0x25c   :  { %v570_v17 = vadd.f32 %v637_v25, %v569_v16 }
 0x25e   :  { %v571_v15 = vrot.slane %v570_v17, 2 }
 0x260   :  { %v572_v8 = vadd.f32 %v571_v15, %v570_v17 }
 0x262   :  { %v573_v19 = vrot.slane %v572_v8, 1 }
 0x264   :  { %v574_v20 = vadd.f32 %v573_v19, %v572_v8 }
 0x266   :  { %638 = vlog2.f32 %v574_v20 }
 0x270   :  { %v639_v22 = vpop.eup %638 }
 0x271   :  { %v576_v18 = vmul.f32 0.6931472, %v639_v22 }
 0x273   :  { %v577_v23 = vadd.f32 %v576_v18, %v565_v0 }
 0x275   :  { %578 = vst [vmem:[%s898_s5] sm:$0x1] %v577_v23 }

</bundles_post_ra>
